<compile_context>
chip_gen: v5e
topology: v5e:2x2
jax: 0.10.0
libtpu: 0.0.40
codegen_flags: <defaults>
</compile_context>

<pallas_src>
import functools

import jax
import jax.numpy as jnp
from jax import lax
from jax.experimental import pallas as pl
from jax.experimental.pallas import tpu as pltpu

_LANES = 128
_MAX_TILE_ROWS = 1024  # 1024 x 128 x 4B = 512 KiB per f32 stream buffer


# ----------------------------------------------------------------------------
# Kernel 1: generate the Bernoulli keep-mask AND apply it (first call).
# ----------------------------------------------------------------------------
def _dropout_gen_kernel(x_ref, y_ref, mask_ref, *, seed_mix, threshold, scale,
                        tile_rows):
    i = pl.program_id(0)
    # Global element index of every element in this tile (row-major over the
    # flattened (rows, 128) slab).  int32 is fine for < 2^31 elements.
    row = lax.broadcasted_iota(jnp.int32, (tile_rows, _LANES), 0)
    col = lax.broadcasted_iota(jnp.int32, (tile_rows, _LANES), 1)
    gidx = ((i * tile_rows + row) * _LANES + col).astype(jnp.uint32)

    # Counter-based PRNG: splitmix32-style mix of (global index XOR seed).
    h = gidx ^ jnp.uint32(seed_mix)
    h = h ^ (h >> jnp.uint32(16))
    h = h * jnp.uint32(0x21F0AAAD)
    h = h ^ (h >> jnp.uint32(15))
    h = h * jnp.uint32(0x735A2D97)
    h = h ^ (h >> jnp.uint32(15))

    # Compare the top 24 bits against a precomputed integer threshold
    # (no int->float convert, no [0,1) multiply).
    r24 = (h >> jnp.uint32(8)).astype(jnp.int32)
    keep = r24 < jnp.int32(threshold)

    mask_ref[...] = keep.astype(jnp.uint8)
    y = x_ref[...].astype(jnp.float32) * keep.astype(jnp.float32) * jnp.float32(scale)
    y_ref[...] = y.astype(y_ref.dtype)


# ----------------------------------------------------------------------------
# Kernel 2: apply an existing cached uint8 keep-mask (subsequent calls).
# ----------------------------------------------------------------------------
def _apply_mask_kernel(x_ref, m_ref, y_ref, *, scale):
    keep_f = m_ref[...].astype(jnp.float32)
    y = x_ref[...].astype(jnp.float32) * keep_f * jnp.float32(scale)
    y_ref[...] = y.astype(y_ref.dtype)


# ----------------------------------------------------------------------------
# Host-side layout helpers (lane-dense (rows, 128) slab).
# ----------------------------------------------------------------------------
def _tile_rows_for(total):
    rows = pl.cdiv(total, _LANES)
    rows8 = ((rows + 7) // 8) * 8           # satisfy the (8, 128) sublane rule
    return min(_MAX_TILE_ROWS, rows8)


def _flatten_lane_dense(x, tile_rows):
    """Flatten (native dtype) to (rows, 128) with rows a multiple of tile_rows."""
    total = x.size
    chunk = tile_rows * _LANES
    pad = (-total) % chunk
    flat = jnp.reshape(x, (-1,))
    if pad:
        flat = jnp.pad(flat, (0, pad))
    return jnp.reshape(flat, (-1, _LANES)), total


def _unflatten(flat2d, total, shape):
    return jnp.reshape(jnp.reshape(flat2d, (-1,))[:total], shape)


# ----------------------------------------------------------------------------
# pallas_call wrappers.
# ----------------------------------------------------------------------------
def dropout_generate_and_apply(x, seed, keep_prob):
    """First-call path: returns (y, mask2d_uint8, total, tile_rows)."""
    tile_rows = _tile_rows_for(x.size)
    x2d, total = _flatten_lane_dense(x, tile_rows)
    rows = x2d.shape[0]
    grid = (rows // tile_rows,)

    threshold = min(int(round(keep_prob * (1 << 24))), 1 << 24)
    scale = 1.0 / keep_prob
    seed_mix = (int(seed) * 0x9E3779B9) & 0xFFFFFFFF

    kernel = functools.partial(
        _dropout_gen_kernel, seed_mix=seed_mix, threshold=threshold,
        scale=scale, tile_rows=tile_rows)

    y2d, m2d = pl.pallas_call(
        kernel,
        out_shape=(
            jax.ShapeDtypeStruct((rows, _LANES), x.dtype),
            jax.ShapeDtypeStruct((rows, _LANES), jnp.uint8),
        ),
        grid=grid,
        in_specs=[pl.BlockSpec((tile_rows, _LANES), lambda i: (i, 0))],
        out_specs=(
            pl.BlockSpec((tile_rows, _LANES), lambda i: (i, 0)),
            pl.BlockSpec((tile_rows, _LANES), lambda i: (i, 0)),
        ),
        compiler_params=pltpu.CompilerParams(
            dimension_semantics=("parallel",)),
    )(x2d)

    y = _unflatten(y2d, total, x.shape)
    return y, m2d, total, tile_rows


def dropout_apply_cached(x, mask2d, keep_prob, tile_rows):
    """Subsequent-call path: y = x * (mask / keep_prob) with the cached uint8 mask."""
    x2d, total = _flatten_lane_dense(x, tile_rows)
    rows = x2d.shape[0]
    assert mask2d.shape == (rows, _LANES), "cached mask layout mismatch"
    grid = (rows // tile_rows,)

    kernel = functools.partial(_apply_mask_kernel, scale=1.0 / keep_prob)

    y2d = pl.pallas_call(
        kernel,
        out_shape=jax.ShapeDtypeStruct((rows, _LANES), x.dtype),
        grid=grid,
        in_specs=[
            pl.BlockSpec((tile_rows, _LANES), lambda i: (i, 0)),
            pl.BlockSpec((tile_rows, _LANES), lambda i: (i, 0)),
        ],
        out_specs=pl.BlockSpec((tile_rows, _LANES), lambda i: (i, 0)),
        compiler_params=pltpu.CompilerParams(
            dimension_semantics=("parallel",)),
    )(x2d, mask2d)

    return _unflatten(y2d, total, x.shape)


# ----------------------------------------------------------------------------
# Module wrapper mirroring the PyTorch MyDropout.
# ----------------------------------------------------------------------------
class MyDropoutPallas:
    """JAX/Pallas port of PyTorch MyDropout (persistent-mask dropout)."""

    def __init__(self, p=0.5, seed=0):
        self.p = p
        self.training = True
        self._seed = seed
        self._mask2d = None        # cached uint8 keep-flags, (rows, 128)
        self._mask_shape = None
        self._mask_total = None
        self._tile_rows = None

    def forward(self, x):
        if not self.training or not self.p:
            return x
        keep_prob = 1.0 - self.p
        if self._mask2d is None:
            y, m2d, total, tile_rows = dropout_generate_and_apply(
                x, self._seed, keep_prob)
            self._mask2d = m2d
            self._mask_shape = x.shape
            self._mask_total = total
            self._tile_rows = tile_rows
            return y
        return dropout_apply_cached(x, self._mask2d, keep_prob, self._tile_rows)

    @property
    def mask(self):
        """Scaled mask in the original shape (like the PyTorch module's .mask)."""
        if self._mask2d is None:
            return None
        keep = _unflatten(self._mask2d, self._mask_total, self._mask_shape)
        return keep.astype(jnp.float32) / (1.0 - self.p)

    def clear_mask(self):
        self._mask2d = None
        self._mask_shape = None
        self._mask_total = None
        self._tile_rows = None

    __call__ = forward


if __name__ == "__main__":
    key = jax.random.PRNGKey(0)
    x = jax.random.normal(key, (2, 4, 16, 16), dtype=jnp.float32)  # NCHW

    drop = MyDropoutPallas(p=0.5, seed=1234)

    # First call: generates and caches the mask inside the kernel.
    y1 = jax.block_until_ready(drop(x))
    # Second call: reuses the cached mask (separate apply kernel).
    y2 = jax.block_until_ready(drop(x))

    mask = drop.mask
    assert y1.shape == x.shape and y1.dtype == x.dtype
    # Mask values are either 0 or 1/(1-p).
    vals = jnp.unique(jnp.round(mask * (1.0 - drop.p)))
    assert bool(jnp.all((vals == 0.0) | (vals == 1.0)))
    # y == x * mask, and repeated calls reuse the same mask.
    assert bool(jnp.allclose(y1, x * mask, atol=1e-6, rtol=1e-6))
    assert bool(jnp.allclose(y1, y2, atol=1e-6, rtol=1e-6))

    # Eval mode is the identity.
    drop.training = False
    y_eval = jax.block_until_ready(drop(x))
    assert bool(jnp.allclose(y_eval, x))

    # clear_mask -> a fresh mask is drawn on the next training call.
    drop.training = True
    drop.clear_mask()
    y3 = jax.block_until_ready(drop(x))
    assert y3.shape == x.shape and y3.dtype == x.dtype

    print("KERNEL_OK")
</pallas_src>

<mosaic_0001>
module attributes {stable_mosaic.version = 11 : i64} {
  func.func @_dropout_gen_kernel(%arg0: i32, %arg1: memref<16x128xf32, #tpu.memory_space<vmem>>, %arg2: memref<16x128xf32, #tpu.memory_space<vmem>>, %arg3: memref<16x128xi8, #tpu.memory_space<vmem>>) attributes {dimension_semantics = [#tpu.dimension_semantics<parallel>], iteration_bounds = array<i64: 1>, scalar_prefetch = 0 : i64, scratch_operands = 0 : i64, tpu.core_type = #tpu.core_type<tc>, window_params = [{transform_indices = @transform_0, window_bounds = array<i64: 16, 128>}, {transform_indices = @transform_1, window_bounds = array<i64: 16, 128>}, {transform_indices = @transform_2, window_bounds = array<i64: 16, 128>}]} {
    %0 = tpu.iota {dimensions = array<i32: 0>} : vector<16x128xi32>
    %1 = tpu.iota {dimensions = array<i32: 1>} : vector<16x128xi32>
    %c16_i32 = arith.constant 16 : i32
    %2 = arith.muli %arg0, %c16_i32 : i32
    %3 = vector.broadcast %2 : i32 to vector<16x128xi32>
    %4 = arith.addi %3, %0 : vector<16x128xi32>
    %c128_i32 = arith.constant 128 : i32
    %5 = vector.broadcast %c128_i32 : i32 to vector<16x128xi32>
    %6 = arith.muli %4, %5 : vector<16x128xi32>
    %7 = arith.addi %6, %1 : vector<16x128xi32>
    %c-1486307902_i32 = arith.constant -1486307902 : i32
    %8 = vector.broadcast %c-1486307902_i32 : i32 to vector<16x128xi32>
    %9 = arith.xori %7, %8 : vector<16x128xi32>
    %c16_i32_0 = arith.constant 16 : i32
    %10 = vector.broadcast %c16_i32_0 : i32 to vector<16x128xi32>
    %11 = arith.shrui %9, %10 : vector<16x128xi32>
    %12 = arith.xori %9, %11 : vector<16x128xi32>
    %c569420461_i32 = arith.constant 569420461 : i32
    %13 = vector.broadcast %c569420461_i32 : i32 to vector<16x128xi32>
    %14 = arith.muli %12, %13 : vector<16x128xi32>
    %c15_i32 = arith.constant 15 : i32
    %15 = vector.broadcast %c15_i32 : i32 to vector<16x128xi32>
    %16 = arith.shrui %14, %15 : vector<16x128xi32>
    %17 = arith.xori %14, %16 : vector<16x128xi32>
    %c1935289751_i32 = arith.constant 1935289751 : i32
    %18 = vector.broadcast %c1935289751_i32 : i32 to vector<16x128xi32>
    %19 = arith.muli %17, %18 : vector<16x128xi32>
    %c15_i32_1 = arith.constant 15 : i32
    %20 = vector.broadcast %c15_i32_1 : i32 to vector<16x128xi32>
    %21 = arith.shrui %19, %20 : vector<16x128xi32>
    %22 = arith.xori %19, %21 : vector<16x128xi32>
    %c8_i32 = arith.constant 8 : i32
    %23 = vector.broadcast %c8_i32 : i32 to vector<16x128xi32>
    %24 = arith.shrui %22, %23 : vector<16x128xi32>
    %c8388608_i32 = arith.constant 8388608 : i32
    %25 = vector.broadcast %c8388608_i32 : i32 to vector<16x128xi32>
    %26 = arith.cmpi slt, %24, %25 : vector<16x128xi32>
    %27 = arith.extui %26 : vector<16x128xi1> to vector<16x128xi8>
    %c0 = arith.constant 0 : index
    %c0_2 = arith.constant 0 : index
    %28 = vector.load %arg3[%c0, %c0_2] : memref<16x128xi8, #tpu.memory_space<vmem>>, vector<16x128xi8>
    tpu.vector_store %arg3[%c0, %c0_2], %27 {strides = array<i32>} : memref<16x128xi8, #tpu.memory_space<vmem>>, vector<16x128xi8>,
    %c0_3 = arith.constant 0 : index
    %c0_4 = arith.constant 0 : index
    %29 = vector.load %arg1[%c0_3, %c0_4] : memref<16x128xf32, #tpu.memory_space<vmem>>, vector<16x128xf32>
    %30 = arith.extui %26 : vector<16x128xi1> to vector<16x128xi32>
    %31 = arith.sitofp %30 : vector<16x128xi32> to vector<16x128xf32>
    %32 = arith.mulf %29, %31 : vector<16x128xf32>
    %cst = arith.constant 2.000000e+00 : f32
    %33 = vector.broadcast %cst : f32 to vector<16x128xf32>
    %34 = arith.mulf %32, %33 : vector<16x128xf32>
    %c0_5 = arith.constant 0 : index
    %c0_6 = arith.constant 0 : index
    %35 = vector.load %arg2[%c0_5, %c0_6] : memref<16x128xf32, #tpu.memory_space<vmem>>, vector<16x128xf32>
    tpu.vector_store %arg2[%c0_5, %c0_6], %34 {strides = array<i32>} : memref<16x128xf32, #tpu.memory_space<vmem>>, vector<16x128xf32>,
    return
  }
  func.func @transform_0(%arg0: i32) -> (i32, i32) {
    %c0_i32 = arith.constant 0 : i32
    %c0_i32_0 = arith.constant 0 : i32
    return %arg0, %c0_i32 : i32, i32
  }
  func.func @transform_1(%arg0: i32) -> (i32, i32) {
    %c0_i32 = arith.constant 0 : i32
    %c0_i32_0 = arith.constant 0 : i32
    return %arg0, %c0_i32 : i32, i32
  }
  func.func @transform_2(%arg0: i32) -> (i32, i32) {
    %c0_i32 = arith.constant 0 : i32
    %c0_i32_0 = arith.constant 0 : i32
    return %arg0, %c0_i32 : i32, i32
  }
}

</mosaic_0001>

<bundles_post_ra>
// kernel: tpu_custom_call.1
= control target key start
LH: loop header
LB: loop body
LE: loop exit
PB: predicated region body
PF: predicated region fallthrough
CT: control target
= control target key end

     0   :  { %8 = vsyncpa [#allocation3], 0  ;;  %s256_s0 = inlined_call_operand.hbm [shape: f32[16,128], index: 0, kind: input, shape index: {}]   ;;  %s257_s1 = inlined_call_operand.hbm [shape: f32[16,128], index: 1, kind: output, shape index: {0}]   ;;  %s258_s2 = inlined_call_operand.hbm [shape: u8[16,128], index: 2, kind: output, shape index: {1}]  }
   0x1   :  { %9 = vsyncpa [#allocation4], 0 }
   0x2   :  { %10 = vsyncpa [#allocation7], 0  ;;  %s15_s11 = sshll.u32 %s256_s0, 4  ;;  %s217_s12 = smov [#allocation2]   ;;  %s16_s11 = int_to_ptr.hbm [resolvable:$true] %s15_s11 }
   0x3   :  { %s17_s13 = sshll.u32 %s217_s12, 4  ;;  %s218_s14 = smov 128   ;;  %s18_s13 = int_to_ptr.vmem [resolvable:$true] %s17_s13 }
   0x4   :  { %s219_s15 = smov 8  }
   0x5   :  { %23 = dma.hbm_to_vmem [thread:$0]  %s16_s11, 256, %s18_s13, [#allocation3], %s218_s14, %s218_s14, %s219_s15  }
   0x6   :  { %211 = dma.done.wait [#allocation3], 256  }
   0x7   :  { %212 = vsyncadd [#allocation3], 4294967040  ;;  %v30_v0 = vlaneseq  ;;  %v79_v27 = vld [vmem:[#allocation2] sm:$0xff]  ;;  %v220_v29 = vmov 0.0   ;;  %v80_v31 = vld [vmem:[#allocation2 + $0x8] sm:$0xff]  ;;  %s221_s0 = smov [#allocation5]  }
   0x8   :  { %s95_s16 = sshll.u32 %s221_s0, 4  ;;  %s97_s19 = sshll.u32 %s257_s1, 4  ;;  %v222_v34 = vmov 0   ;;  %s96_s16 = int_to_ptr.vmem [resolvable:$true] %s95_s16  ;;  %s98_s19 = int_to_ptr.hbm [resolvable:$true] %s97_s19 }
   0x9   :  { %v31_v1 = vshrl.u32 %v30_v0, 7  ;;  %v34_v2 = vand.u32 127, %v30_v0  ;;  %s223_s20 = smov [#allocation6]   ;;  %s110_s23 = sshll.u32 %s258_s2, 4  ;;  %s111_s23 = int_to_ptr.hbm [resolvable:$true] %s110_s23 }
   0xa   :  { %s108_s1 = sshll.u32 %s223_s20, 4  ;;  %s224_s24 = smov 32   ;;  %s109_s1 = int_to_ptr.vmem [resolvable:$true] %s108_s1 }
   0xb   :  { %v32_v3 = vadd.s32 8, %v31_v1  ;;  %v39_v4 = vmul.u32 128, %v31_v1  ;;  %s225_s25 = smov 2  }
   0xd   :  { %v40_v5 = vmul.u32 128, %v32_v3  ;;  %v41_v6 = vadd.s32 %v39_v4, %v34_v2 }
   0xf   :  { %v42_v7 = vadd.s32 %v40_v5, %v34_v2  ;;  %v43_v8 = vxor.u32 2808659394, %v41_v6 }
  0x11   :  { %v44_v9 = vxor.u32 2808659394, %v42_v7  ;;  %v45_v10 = vshrl.u32 %v43_v8, 16 }
  0x13   :  { %v46_v11 = vshrl.u32 %v44_v9, 16  ;;  %v47_v12 = vxor.u32 %v45_v10, %v43_v8 }
  0x15   :  { %v48_v13 = vxor.u32 %v46_v11, %v44_v9  ;;  %v49_v14 = vmul.u32 569420461, %v47_v12 }
  0x17   :  { %v50_v15 = vmul.u32 569420461, %v48_v13  ;;  %v51_v16 = vshrl.u32 %v49_v14, 15 }
  0x19   :  { %v52_v17 = vshrl.u32 %v50_v15, 15  ;;  %v53_v18 = vxor.u32 %v51_v16, %v49_v14 }
  0x1b   :  { %v54_v19 = vxor.u32 %v52_v17, %v50_v15  ;;  %v55_v20 = vmul.u32 1935289751, %v53_v18 }
  0x1d   :  { %v56_v21 = vmul.u32 1935289751, %v54_v19  ;;  %v57_v22 = vshrl.u32 %v55_v20, 15 }
  0x1f   :  { %v58_v23 = vshrl.u32 %v56_v21, 15  ;;  %v59_v24 = vxor.u32 %v57_v22, %v55_v20 }
  0x21   :  { %v60_v25 = vxor.u32 %v58_v23, %v56_v21  ;;  %v61_v26 = vshrl.u32 %v59_v24, 8 }
  0x23   :  { %v62_v28 = vshrl.u32 %v60_v25, 8  ;;  %vm63_vm0 = vcmp.lt.s32.totalorder %v61_v26, 8388608 }
  0x24   :  { %v128_v30 = vsel %vm63_vm0, 1.0, %v220_v29 }
  0x25   :  { %vm64_vm1 = vcmp.lt.s32.totalorder %v62_v28, 8388608  ;;  %v85_v32 = vmul.f32 %v128_v30, %v79_v27 }
  0x26   :  { %vm65_vm2 = vmpackc.low %vm64_vm1, %vm63_vm0  ;;  %v129_v33 = vsel %vm64_vm1, 1.0, %v220_v29 }
  0x27   :  { %v66_v35 = vsel %vm65_vm2, 16711935, %v222_v34  ;;  %v87_v36 = vmul.f32 2.0, %v85_v32  ;;  %v86_v37 = vmul.f32 %v129_v33, %v80_v31 }
  0x28   :  { %v68_v38 = vpack.c.b8 %v66_v35, %v66_v35 }
  0x29   :  { %89 = vst [vmem:[#allocation5] sm:$0xff] %v87_v36  ;;  %v88_v39 = vmul.f32 2.0, %v86_v37 }
  0x2a   :  { %vm69_vm3 = vnez %v68_v38 }
  0x2b   :  { %v70_v40 = vsel %vm69_vm3, 16843009, %v222_v34  ;;  %90 = vst [vmem:[#allocation5 + $0x8] sm:$0xff] %v88_v39 }
  0x2c   :  { %v71_v41 = vunpack.c.0.s8 %v70_v40  ;;  %v72_v42 = vunpack.c.1.s8 %v70_v40  ;;  %103 = dma.vmem_to_hbm [thread:$0]  %s96_s16, 256, %s98_s19, [#allocation4], %s218_s14, %s218_s14, %s219_s15  }
  0x2e   :  { %v73_v43 = vpack.c.b16 %v71_v41, %v71_v41  ;;  %v75_v44 = vpack.c.b16 %v72_v42, %v72_v42 }
  0x30   :  { %v74_v45 = vpack.c.b8 %v73_v43, %v73_v43  ;;  %v76_v46 = vpack.c.b8 %v75_v44, %v75_v44 }
  0x32   :  { %77 = vst [vmem:[#allocation6] sm:$0x3] %v74_v45 }
  0x33   :  { %78 = vst [vmem:[#allocation6 + $0x2] sm:$0x3] %v76_v46 }
  0x34   :  { %116 = dma.vmem_to_hbm [thread:$0]  %s109_s1, 64, %s111_s23, [#allocation7], %s224_s24, %s224_s24, %s225_s25  }
  0x35   :  { %213 = dma.done.wait [#allocation4], 256  }
  0x36   :  { %214 = vsyncadd [#allocation4], 4294967040 }
  0x37   :  { %215 = dma.done.wait [#allocation7], 64  }
  0x38   :  { %216 = vsyncadd [#allocation7], 4294967232 }
  0x39   :  { %125 = vsyncpa [#allocation3], 1 }
  0x3a   :  { %126 = vsyncpa [#allocation4], 1 }
  0x3b   :  { %127 = vsyncpa [#allocation7], 1 }

</bundles_post_ra>
